<compile_context>
chip_gen: v7x
topology: tpu7x:2x2x1
jax: 0.10.0
libtpu: 0.0.40
codegen_flags: <defaults>
</compile_context>

<pallas_src>
import functools

import jax
import jax.numpy as jnp
from jax import lax
from jax.experimental import pallas as pl
from jax.experimental.pallas import tpu as pltpu


# --------------------------------------------------------------------------------------
# Kernel
# --------------------------------------------------------------------------------------
def _sse_kernel(x_ref, top_ref, bot_ref, w_ref, b3_ref, w1_ref, o_ref, *, W, PAD):
    # x_ref  : (1, C, TH*W)    image tile, channels on sublanes, flat spatial on lanes
    # top_ref: (1, 1, C, PAD)  row above the tile, stored in lanes [PAD-W, PAD), zeros elsewhere
    # bot_ref: (1, 1, C, PAD)  row below the tile, stored in lanes [0, W), zeros elsewhere
    # w_ref  : (3, C, 3C) bf16 BN-folded conv slabs, slab[kh][co, kw*C + ci]
    # b3_ref : (C, 1) f32      folded BatchNorm shift
    # w1_ref : (C, 1) f32      Conv1x1 (C -> 1, no bias) weight
    C, TW = x_ref.shape[1], x_ref.shape[2]
    x = x_ref[0]                                                  # (C, TW), source dtype

    # [top halo row | tile rows | bottom halo row]; every piece is a multiple of 128 lanes.
    ext = jnp.concatenate([top_ref[0, 0], x, bot_ref[0, 0]], axis=1)   # (C, TW + 2*PAD)

    col = lax.broadcasted_iota(jnp.int32, (1, TW), 1) % W
    left_ok = col >= 1                                            # dw = -1 stays inside the row
    right_ok = col < (W - 1)                                      # dw = +1 stays inside the row

    acc = None
    for g, dh in enumerate((-1, 0, 1)):                           # static 3-iteration loop, 3 dots
        taps = []
        for dw in (-1, 0, 1):
            start = PAD + dh * W + dw                             # static lane offset into ext
            xs = ext[:, start:start + TW]                         # lane-shifted neighbour view
            if dw == -1:
                xs = jnp.where(left_ok, xs, 0)
            elif dw == 1:
                xs = jnp.where(right_ok, xs, 0)
            taps.append(xs.astype(jnp.bfloat16))
        stacked = jnp.concatenate(taps, axis=0)                   # (3C, TW) bf16 MXU operand
        part = jnp.dot(w_ref[g], stacked, preferred_element_type=jnp.float32)
        acc = part if acc is None else acc + part                 # f32 accumulator

    r = jnp.maximum(acc + b3_ref[...], 0.0)                       # folded BN shift + ReLU, f32
    s = jnp.sum(w1_ref[...] * r, axis=0, keepdims=True)           # 1x1 conv: VPU mul + sublane sum
    q = jax.nn.sigmoid(s)                                         # (1, TW), EUP
    o_ref[0] = (x * q).astype(o_ref.dtype)                        # lane-dense full-width store


# --------------------------------------------------------------------------------------
# Host-side helpers
# --------------------------------------------------------------------------------------
def _vmem_limit_bytes():
    """Per-generation VMEM budget: ~3/4 of physical, capped at 96 MiB (48 MiB on v7x)."""
    try:
        cap = int(getattr(pltpu.get_tpu_info(), "vmem_capacity_bytes"))
        return int(min(cap * 3 // 4, 96 * 1024 * 1024))
    except Exception:
        return 64 * 1024 * 1024


def _pick_tile_rows(H, W, C, in_itemsize, vmem_limit, tile_rows):
    """Largest row-tile TH with H % TH == 0, TH*W % 128 == 0, and a working set under budget."""
    if tile_rows is not None:
        tile_rows = int(tile_rows)
        if H % tile_rows != 0:
            raise ValueError("tile_rows must divide H")
        if (tile_rows * W) % 128 != 0 and tile_rows != H:
            raise ValueError("tile_rows * W must be a multiple of 128 (or tile_rows == H)")
        return tile_rows
    candidates = [th for th in range(1, H + 1) if H % th == 0 and (th * W) % 128 == 0]
    if not candidates:
        return H                                   # fall back to whole image per grid step
    pad = (W // 128 + 1) * 128
    budget = int(vmem_limit * 0.4)
    best = candidates[0]                           # smallest valid tile as last resort
    for th in candidates:                          # ascending; keep the largest that fits
        tw = th * W
        est = (C * tw * (8 * in_itemsize + 16)     # tile dbl-buf, ext, tap temps, bf16 stack, acc
               + 6 * C * pad * in_itemsize         # halo slabs (double-buffered)
               + 36 * C * C + (1 << 16))           # bf16 weight slabs (double-buffered) + slack
        if est <= budget:
            best = th
    return best


def sse_forward(u, conv3_w, bn_gamma, bn_beta, bn_mean, bn_var, conv1_w,
                *, bn_eps=1e-5, tile_rows=None):
    """Pallas implementation of sSE.forward (eval-mode BatchNorm folded into the conv).

    u      : (B, C, H, W)         activations
    conv3_w: (C, C, 3, 3)         Conv2d(C, C, 3, padding=1, bias=False).weight
    bn_*   : (C,)                 BatchNorm2d affine params + running stats
    conv1_w: (C,)                 Conv2d(C, 1, 1, bias=False).weight squeezed
    returns (B, C, H, W), same dtype as u
    """
    B, C, H, W = u.shape
    HW = H * W
    in_dt = u.dtype

    # ---- fold eval-mode BatchNorm into the 3x3 conv; pack per-kh (C, 3C) bf16 weight slabs ----
    scale = (bn_gamma / jnp.sqrt(bn_var + bn_eps)).astype(jnp.float32)         # (C,)
    shift = (bn_beta - bn_mean * scale).astype(jnp.float32)                    # (C,)
    w3f = conv3_w.astype(jnp.float32) * scale[:, None, None, None]             # (Co, Ci, 3, 3)
    # slab[kh][co, kw*C + ci] = w3f[co, ci, kh, kw]  (matches the in-kernel dw-major stacking)
    w_slabs = jnp.transpose(w3f, (2, 0, 3, 1)).reshape(3, C, 3 * C).astype(jnp.bfloat16)
    b3 = shift.reshape(C, 1)
    w1 = conv1_w.reshape(C, 1).astype(jnp.float32)

    vmem_limit = _vmem_limit_bytes()
    TH = _pick_tile_rows(H, W, C, jnp.dtype(in_dt).itemsize, vmem_limit, tile_rows)
    nt = H // TH
    TW = TH * W
    PAD = (W // 128 + 1) * 128                     # lane-aligned halo slab width (>= W + 1)

    # ---- lane-dense flat view (free) + tiny per-tile halo-row slabs (row-sized host prep) ----
    x = u.reshape(B, C, HW)
    zrow = jnp.zeros((B, C, 1, W), in_dt)
    top = jnp.concatenate([zrow, u[:, :, TH - 1:H - 1:TH, :]], axis=2)         # row above each tile
    bot = jnp.concatenate([u[:, :, TH:H:TH, :], zrow], axis=2)                 # row below each tile
    top = jnp.transpose(jnp.pad(top, ((0, 0), (0, 0), (0, 0), (PAD - W, 0))), (0, 2, 1, 3))
    bot = jnp.transpose(jnp.pad(bot, ((0, 0), (0, 0), (0, 0), (0, PAD - W))), (0, 2, 1, 3))

    kernel = functools.partial(_sse_kernel, W=W, PAD=PAD)

    out = pl.pallas_call(
        kernel,
        out_shape=jax.ShapeDtypeStruct((B, C, HW), in_dt),
        grid_spec=pltpu.PrefetchScalarGridSpec(
            num_scalar_prefetch=0,
            grid=(B, nt),
            in_specs=[
                pl.BlockSpec((1, C, TW), lambda b, t: (b, 0, t)),              # image tile (TH rows)
                pl.BlockSpec((1, 1, C, PAD), lambda b, t: (b, t, 0, 0)),       # halo row above
                pl.BlockSpec((1, 1, C, PAD), lambda b, t: (b, t, 0, 0)),       # halo row below
                # constant index_maps -> fetched once and kept resident across the grid
                pl.BlockSpec((3, C, 3 * C), lambda b, t: (0, 0, 0)),           # bf16 conv slabs
                pl.BlockSpec((C, 1), lambda b, t: (0, 0)),                     # folded BN shift
                pl.BlockSpec((C, 1), lambda b, t: (0, 0)),                     # 1x1 conv weight
            ],
            out_specs=pl.BlockSpec((1, C, TW), lambda b, t: (b, 0, t)),
        ),
        compiler_params=pltpu.CompilerParams(
            dimension_semantics=("parallel", "parallel"),  # batch and row-tiles split across TCs
            vmem_limit_bytes=vmem_limit,
        ),
    )(x, top, bot, w_slabs, b3, w1)

    return out.reshape(B, C, H, W)


# --------------------------------------------------------------------------------------
# Plain-JAX reference (PyTorch eval-mode semantics); conv_dtype emulates the bf16 MXU operands.
# --------------------------------------------------------------------------------------
def sse_reference(U, conv3_w, bn_gamma, bn_beta, bn_mean, bn_var, conv1_w,
                  *, bn_eps=1e-5, conv_dtype=None):
    B, C, H, W = U.shape
    scale = bn_gamma / jnp.sqrt(bn_var + bn_eps)
    shift = bn_beta - bn_mean * scale
    w = conv3_w.astype(jnp.float32) * scale[:, None, None, None]
    xin = U.astype(jnp.float32)
    if conv_dtype is not None:
        w = w.astype(conv_dtype).astype(jnp.float32)
        xin = xin.astype(conv_dtype).astype(jnp.float32)
    Up = jnp.pad(xin, ((0, 0), (0, 0), (1, 1), (1, 1)))
    v = jnp.zeros((B, C, H, W), jnp.float32)
    for kh in range(3):
        for kw in range(3):
            xs = Up[:, :, kh:kh + H, kw:kw + W]                                # (B, Ci, H, W)
            wt = w[:, :, kh, kw]                                               # (Co, Ci)
            v = v + jnp.sum(wt[None, :, :, None, None] * xs[:, None, :, :, :], axis=2)
    v = jnp.maximum(v + shift[None, :, None, None], 0.0)
    q = jax.nn.sigmoid(jnp.sum(v * conv1_w[None, :, None, None], axis=1, keepdims=True))
    return U * q


# --------------------------------------------------------------------------------------
# Test
# --------------------------------------------------------------------------------------
def _make_params(key, C):
    k_w3, k_w1, k_g, k_b, k_m, k_v = jax.random.split(key, 6)
    bnd3 = 1.0 / ((C * 9) ** 0.5)
    conv3_w = jax.random.uniform(k_w3, (C, C, 3, 3), minval=-bnd3, maxval=bnd3, dtype=jnp.float32)
    bnd1 = 1.0 / (C ** 0.5)
    conv1_w = jax.random.uniform(k_w1, (C,), minval=-bnd1, maxval=bnd1, dtype=jnp.float32)
    bn_gamma = jax.random.uniform(k_g, (C,), minval=0.5, maxval=1.5, dtype=jnp.float32)
    bn_beta = 0.1 * jax.random.normal(k_b, (C,), dtype=jnp.float32)
    bn_mean = 0.1 * jax.random.normal(k_m, (C,), dtype=jnp.float32)
    bn_var = jax.random.uniform(k_v, (C,), minval=0.5, maxval=1.5, dtype=jnp.float32)
    return conv3_w, bn_gamma, bn_beta, bn_mean, bn_var, conv1_w


if __name__ == "__main__":
    root = jax.random.PRNGKey(0)
    k_u1, k_p1, k_u2, k_p2 = jax.random.split(root, 4)

    # Test 1: small shapes, forced 2-row-tile grid (exercises the halo path + tiny C).
    B, C, H, W = 2, 4, 16, 16
    U1 = jax.random.normal(k_u1, (B, C, H, W), dtype=jnp.float32)
    p1 = _make_params(k_p1, C)
    out1 = jax.block_until_ready(sse_forward(U1, *p1, tile_rows=8))
    assert out1.shape == (B, C, H, W)
    ref1_bf16 = sse_reference(U1, *p1, conv_dtype=jnp.bfloat16)   # emulates bf16 MXU operands
    ref1_f32 = sse_reference(U1, *p1)                             # pure-f32 PyTorch semantics
    assert jnp.allclose(out1, ref1_bf16, atol=1e-3, rtol=1e-3), "tiled path mismatch (bf16 ref)"
    assert jnp.allclose(out1, ref1_f32, atol=5e-2, rtol=5e-2), "tiled path drift vs f32 ref"

    # Test 2: larger channel count, auto tile selection (exercises the deeper MXU contraction).
    B, C, H, W = 1, 32, 32, 32
    U2 = jax.random.normal(k_u2, (B, C, H, W), dtype=jnp.float32)
    p2 = _make_params(k_p2, C)
    out2 = jax.block_until_ready(sse_forward(U2, *p2))
    assert out2.shape == (B, C, H, W)
    ref2_bf16 = sse_reference(U2, *p2, conv_dtype=jnp.bfloat16)
    ref2_f32 = sse_reference(U2, *p2)
    assert jnp.allclose(out2, ref2_bf16, atol=1e-3, rtol=1e-3), "large-C path mismatch (bf16 ref)"
    assert jnp.allclose(out2, ref2_f32, atol=5e-2, rtol=5e-2), "large-C path drift vs f32 ref"

    print("KERNEL_OK")
</pallas_src>

<mosaic_0001>
module attributes {stable_mosaic.version = 11 : i64} {
  func.func @_sse_kernel(%arg0: i32, %arg1: i32, %arg2: memref<1x4x128xf32, #tpu.memory_space<vmem>>, %arg3: memref<1x1x4x128xf32, #tpu.memory_space<vmem>>, %arg4: memref<1x1x4x128xf32, #tpu.memory_space<vmem>>, %arg5: memref<3x4x12xbf16, #tpu.memory_space<vmem>>, %arg6: memref<4x1xf32, #tpu.memory_space<vmem>>, %arg7: memref<4x1xf32, #tpu.memory_space<vmem>>, %arg8: memref<1x4x128xf32, #tpu.memory_space<vmem>>) attributes {dimension_semantics = [#tpu.dimension_semantics<parallel>, #tpu.dimension_semantics<parallel>], iteration_bounds = array<i64: 2, 2>, scalar_prefetch = 0 : i64, scratch_operands = 0 : i64, tpu.core_type = #tpu.core_type<tc>, window_params = [{transform_indices = @transform_0, window_bounds = array<i64: 1, 4, 128>}, {transform_indices = @transform_1, window_bounds = array<i64: 1, 1, 4, 128>}, {transform_indices = @transform_2, window_bounds = array<i64: 1, 1, 4, 128>}, {pipeline_mode = #tpu.pipeline_mode<synchronous>, transform_indices = @transform_3, window_bounds = array<i64: 3, 4, 12>}, {pipeline_mode = #tpu.pipeline_mode<synchronous>, transform_indices = @transform_4, window_bounds = array<i64: 4, 1>}, {pipeline_mode = #tpu.pipeline_mode<synchronous>, transform_indices = @transform_5, window_bounds = array<i64: 4, 1>}, {transform_indices = @transform_6, window_bounds = array<i64: 1, 4, 128>}]} {
    %c0 = arith.constant 0 : index
    %c0_0 = arith.constant 0 : index
    %c0_1 = arith.constant 0 : index
    %0 = vector.load %arg2[%c0, %c0_0, %c0_1] : memref<1x4x128xf32, #tpu.memory_space<vmem>>, vector<1x4x128xf32>
    %1 = vector.shape_cast %0 : vector<1x4x128xf32> to vector<4x128xf32>
    %c0_2 = arith.constant 0 : index
    %c0_3 = arith.constant 0 : index
    %c0_4 = arith.constant 0 : index
    %c0_5 = arith.constant 0 : index
    %2 = vector.load %arg3[%c0_2, %c0_3, %c0_4, %c0_5] : memref<1x1x4x128xf32, #tpu.memory_space<vmem>>, vector<1x1x4x128xf32>
    %3 = vector.shape_cast %2 : vector<1x1x4x128xf32> to vector<4x128xf32>
    %c0_6 = arith.constant 0 : index
    %c0_7 = arith.constant 0 : index
    %c0_8 = arith.constant 0 : index
    %c0_9 = arith.constant 0 : index
    %4 = vector.load %arg4[%c0_6, %c0_7, %c0_8, %c0_9] : memref<1x1x4x128xf32, #tpu.memory_space<vmem>>, vector<1x1x4x128xf32>
    %5 = vector.shape_cast %4 : vector<1x1x4x128xf32> to vector<4x128xf32>
    %6 = tpu.concatenate %3, %1, %5 in 1 : vector<4x128xf32>, vector<4x128xf32>, vector<4x128xf32> -> vector<4x384xf32>
    %7 = tpu.iota {dimensions = array<i32: 1>} : vector<1x128xi32>
    %c16_i32 = arith.constant 16 : i32
    %c0_i32 = arith.constant 0 : i32
    %8 = arith.cmpi eq, %c16_i32, %c0_i32 : i32
    %c1_i32 = arith.constant 1 : i32
    %9 = arith.select %8, %c1_i32, %c16_i32 : i32
    %10 = vector.broadcast %9 : i32 to vector<1x128xi32>
    %11 = arith.remsi %7, %10 : vector<1x128xi32>
    %c0_i32_10 = arith.constant 0 : i32
    %12 = vector.broadcast %c0_i32_10 : i32 to vector<1x128xi32>
    %13 = arith.cmpi ne, %11, %12 : vector<1x128xi32>
    %c0_i32_11 = arith.constant 0 : i32
    %14 = vector.broadcast %c0_i32_11 : i32 to vector<1x128xi32>
    %15 = arith.cmpi slt, %11, %14 : vector<1x128xi32>
    %c0_i32_12 = arith.constant 0 : i32
    %16 = arith.cmpi slt, %9, %c0_i32_12 : i32
    %17 = vector.broadcast %16 : i1 to vector<1x128xi1>
    %18 = vector.broadcast %17 : vector<1x128xi1> to vector<1x128xi1>
    %19 = arith.xori %15, %18 : vector<1x128xi1>
    %20 = arith.andi %19, %13 : vector<1x128xi1>
    %21 = vector.broadcast %9 : i32 to vector<1x128xi32>
    %22 = arith.addi %11, %21 : vector<1x128xi32>
    %23 = arith.select %20, %22, %11 : vector<1x128xi1>, vector<1x128xi32>
    %c1_i32_13 = arith.constant 1 : i32
    %24 = vector.broadcast %c1_i32_13 : i32 to vector<1x128xi32>
    %25 = arith.cmpi sge, %23, %24 : vector<1x128xi32>
    %c15_i32 = arith.constant 15 : i32
    %26 = vector.broadcast %c15_i32 : i32 to vector<1x128xi32>
    %27 = arith.cmpi slt, %23, %26 : vector<1x128xi32>
    %28 = vector.extract_strided_slice %6 {offsets = [0, 111], sizes = [4, 128], strides = [1, 1]} : vector<4x384xf32> to vector<4x128xf32>
    %c0_i32_14 = arith.constant 0 : i32
    %29 = arith.sitofp %c0_i32_14 : i32 to f32
    %30 = vector.shape_cast %25 : vector<1x128xi1> to vector<1x128xi1>
    %31 = vector.broadcast %30 : vector<1x128xi1> to vector<4x128xi1>
    %32 = vector.broadcast %29 : f32 to vector<4x128xf32>
    %33 = arith.select %31, %28, %32 : vector<4x128xi1>, vector<4x128xf32>
    %34 = arith.truncf %33 : vector<4x128xf32> to vector<4x128xbf16>
    %35 = vector.extract_strided_slice %6 {offsets = [0, 112], sizes = [4, 128], strides = [1, 1]} : vector<4x384xf32> to vector<4x128xf32>
    %36 = arith.truncf %35 : vector<4x128xf32> to vector<4x128xbf16>
    %37 = vector.extract_strided_slice %6 {offsets = [0, 113], sizes = [4, 128], strides = [1, 1]} : vector<4x384xf32> to vector<4x128xf32>
    %c0_i32_15 = arith.constant 0 : i32
    %38 = arith.sitofp %c0_i32_15 : i32 to f32
    %39 = vector.shape_cast %27 : vector<1x128xi1> to vector<1x128xi1>
    %40 = vector.broadcast %39 : vector<1x128xi1> to vector<4x128xi1>
    %41 = vector.broadcast %38 : f32 to vector<4x128xf32>
    %42 = arith.select %40, %37, %41 : vector<4x128xi1>, vector<4x128xf32>
    %43 = arith.truncf %42 : vector<4x128xf32> to vector<4x128xbf16>
    %44 = tpu.concatenate %34, %36, %43 in 0 : vector<4x128xbf16>, vector<4x128xbf16>, vector<4x128xbf16> -> vector<12x128xbf16>
    %c0_16 = arith.constant 0 : index
    %c0_17 = arith.constant 0 : index
    %c0_18 = arith.constant 0 : index
    %45 = vector.load %arg5[%c0_16, %c0_17, %c0_18] : memref<3x4x12xbf16, #tpu.memory_space<vmem>>, vector<1x4x12xbf16>
    %46 = vector.shape_cast %45 : vector<1x4x12xbf16> to vector<4x12xbf16>
    %cst = arith.constant dense<0.000000e+00> : vector<4x128xf32>
    %47 = tpu.matmul %46, %44, %cst {dimension_numbers = #tpu.dot_dimension_numbers<[1], [0], [0], [1], [0, 0, 1, 1], [], []>} : vector<4x12xbf16>, vector<12x128xbf16>, vector<4x128xf32> -> vector<4x128xf32>
    %48 = vector.extract_strided_slice %6 {offsets = [0, 127], sizes = [4, 128], strides = [1, 1]} : vector<4x384xf32> to vector<4x128xf32>
    %c0_i32_19 = arith.constant 0 : i32
    %49 = arith.sitofp %c0_i32_19 : i32 to f32
    %50 = vector.shape_cast %25 : vector<1x128xi1> to vector<1x128xi1>
    %51 = vector.broadcast %50 : vector<1x128xi1> to vector<4x128xi1>
    %52 = vector.broadcast %49 : f32 to vector<4x128xf32>
    %53 = arith.select %51, %48, %52 : vector<4x128xi1>, vector<4x128xf32>
    %54 = arith.truncf %53 : vector<4x128xf32> to vector<4x128xbf16>
    %55 = vector.extract_strided_slice %6 {offsets = [0, 128], sizes = [4, 128], strides = [1, 1]} : vector<4x384xf32> to vector<4x128xf32>
    %56 = arith.truncf %55 : vector<4x128xf32> to vector<4x128xbf16>
    %57 = vector.extract_strided_slice %6 {offsets = [0, 129], sizes = [4, 128], strides = [1, 1]} : vector<4x384xf32> to vector<4x128xf32>
    %c0_i32_20 = arith.constant 0 : i32
    %58 = arith.sitofp %c0_i32_20 : i32 to f32
    %59 = vector.shape_cast %27 : vector<1x128xi1> to vector<1x128xi1>
    %60 = vector.broadcast %59 : vector<1x128xi1> to vector<4x128xi1>
    %61 = vector.broadcast %58 : f32 to vector<4x128xf32>
    %62 = arith.select %60, %57, %61 : vector<4x128xi1>, vector<4x128xf32>
    %63 = arith.truncf %62 : vector<4x128xf32> to vector<4x128xbf16>
    %64 = tpu.concatenate %54, %56, %63 in 0 : vector<4x128xbf16>, vector<4x128xbf16>, vector<4x128xbf16> -> vector<12x128xbf16>
    %c1 = arith.constant 1 : index
    %c0_21 = arith.constant 0 : index
    %c0_22 = arith.constant 0 : index
    %65 = vector.load %arg5[%c1, %c0_21, %c0_22] : memref<3x4x12xbf16, #tpu.memory_space<vmem>>, vector<1x4x12xbf16>
    %66 = vector.shape_cast %65 : vector<1x4x12xbf16> to vector<4x12xbf16>
    %cst_23 = arith.constant dense<0.000000e+00> : vector<4x128xf32>
    %67 = tpu.matmul %66, %64, %cst_23 {dimension_numbers = #tpu.dot_dimension_numbers<[1], [0], [0], [1], [0, 0, 1, 1], [], []>} : vector<4x12xbf16>, vector<12x128xbf16>, vector<4x128xf32> -> vector<4x128xf32>
    %68 = arith.addf %47, %67 : vector<4x128xf32>
    %69 = vector.extract_strided_slice %6 {offsets = [0, 143], sizes = [4, 128], strides = [1, 1]} : vector<4x384xf32> to vector<4x128xf32>
    %c0_i32_24 = arith.constant 0 : i32
    %70 = arith.sitofp %c0_i32_24 : i32 to f32
    %71 = vector.shape_cast %25 : vector<1x128xi1> to vector<1x128xi1>
    %72 = vector.broadcast %71 : vector<1x128xi1> to vector<4x128xi1>
    %73 = vector.broadcast %70 : f32 to vector<4x128xf32>
    %74 = arith.select %72, %69, %73 : vector<4x128xi1>, vector<4x128xf32>
    %75 = arith.truncf %74 : vector<4x128xf32> to vector<4x128xbf16>
    %76 = vector.extract_strided_slice %6 {offsets = [0, 144], sizes = [4, 128], strides = [1, 1]} : vector<4x384xf32> to vector<4x128xf32>
    %77 = arith.truncf %76 : vector<4x128xf32> to vector<4x128xbf16>
    %78 = vector.extract_strided_slice %6 {offsets = [0, 145], sizes = [4, 128], strides = [1, 1]} : vector<4x384xf32> to vector<4x128xf32>
    %c0_i32_25 = arith.constant 0 : i32
    %79 = arith.sitofp %c0_i32_25 : i32 to f32
    %80 = vector.shape_cast %27 : vector<1x128xi1> to vector<1x128xi1>
    %81 = vector.broadcast %80 : vector<1x128xi1> to vector<4x128xi1>
    %82 = vector.broadcast %79 : f32 to vector<4x128xf32>
    %83 = arith.select %81, %78, %82 : vector<4x128xi1>, vector<4x128xf32>
    %84 = arith.truncf %83 : vector<4x128xf32> to vector<4x128xbf16>
    %85 = tpu.concatenate %75, %77, %84 in 0 : vector<4x128xbf16>, vector<4x128xbf16>, vector<4x128xbf16> -> vector<12x128xbf16>
    %c2 = arith.constant 2 : index
    %c0_26 = arith.constant 0 : index
    %c0_27 = arith.constant 0 : index
    %86 = vector.load %arg5[%c2, %c0_26, %c0_27] : memref<3x4x12xbf16, #tpu.memory_space<vmem>>, vector<1x4x12xbf16>
    %87 = vector.shape_cast %86 : vector<1x4x12xbf16> to vector<4x12xbf16>
    %cst_28 = arith.constant dense<0.000000e+00> : vector<4x128xf32>
    %88 = tpu.matmul %87, %85, %cst_28 {dimension_numbers = #tpu.dot_dimension_numbers<[1], [0], [0], [1], [0, 0, 1, 1], [], []>} : vector<4x12xbf16>, vector<12x128xbf16>, vector<4x128xf32> -> vector<4x128xf32>
    %89 = arith.addf %68, %88 : vector<4x128xf32>
    %c0_29 = arith.constant 0 : index
    %c0_30 = arith.constant 0 : index
    %90 = vector.load %arg6[%c0_29, %c0_30] : memref<4x1xf32, #tpu.memory_space<vmem>>, vector<4x1xf32>
    %91 = vector.broadcast %90 : vector<4x1xf32> to vector<4x128xf32>
    %92 = arith.addf %89, %91 : vector<4x128xf32>
    %cst_31 = arith.constant 0.000000e+00 : f32
    %93 = vector.broadcast %cst_31 : f32 to vector<4x128xf32>
    %94 = arith.maximumf %92, %93 : vector<4x128xf32>
    %c0_32 = arith.constant 0 : index
    %c0_33 = arith.constant 0 : index
    %95 = vector.load %arg7[%c0_32, %c0_33] : memref<4x1xf32, #tpu.memory_space<vmem>>, vector<4x1xf32>
    %96 = vector.broadcast %95 : vector<4x1xf32> to vector<4x128xf32>
    %97 = arith.mulf %96, %94 : vector<4x128xf32>
    %cst_34 = arith.constant dense<0.000000e+00> : vector<128xf32>
    %98 = vector.multi_reduction <add>, %97, %cst_34 [0] : vector<4x128xf32> to vector<128xf32>
    %99 = vector.shape_cast %98 : vector<128xf32> to vector<1x128xf32>
    %100 = arith.negf %99 : vector<1x128xf32>
    %101 = math.exp %100 : vector<1x128xf32>
    %cst_35 = arith.constant 1.000000e+00 : f32
    %102 = vector.broadcast %cst_35 : f32 to vector<1x128xf32>
    %103 = arith.addf %102, %101 : vector<1x128xf32>
    %104 = arith.divf %102, %103 : vector<1x128xf32>
    %105 = vector.broadcast %104 : vector<1x128xf32> to vector<4x128xf32>
    %106 = arith.mulf %1, %105 : vector<4x128xf32>
    %c0_36 = arith.constant 0 : index
    %c0_37 = arith.constant 0 : index
    %c0_38 = arith.constant 0 : index
    %107 = vector.load %arg8[%c0_36, %c0_37, %c0_38] : memref<1x4x128xf32, #tpu.memory_space<vmem>>, vector<1x4x128xf32>
    %108 = vector.shape_cast %107 : vector<1x4x128xf32> to vector<4x128xf32>
    %109 = vector.shape_cast %106 : vector<4x128xf32> to vector<1x4x128xf32>
    tpu.vector_store %arg8[%c0_36, %c0_37, %c0_38], %109 {strides = array<i32>} : memref<1x4x128xf32, #tpu.memory_space<vmem>>, vector<1x4x128xf32>,
    return
  }
  func.func @transform_0(%arg0: i32, %arg1: i32) -> (i32, i32, i32) {
    %c0_i32 = arith.constant 0 : i32
    %c0_i32_0 = arith.constant 0 : i32
    return %arg0, %c0_i32, %arg1 : i32, i32, i32
  }
  func.func @transform_1(%arg0: i32, %arg1: i32) -> (i32, i32, i32, i32) {
    %c0_i32 = arith.constant 0 : i32
    %c0_i32_0 = arith.constant 0 : i32
    %c0_i32_1 = arith.constant 0 : i32
    return %arg0, %arg1, %c0_i32, %c0_i32_0 : i32, i32, i32, i32
  }
  func.func @transform_2(%arg0: i32, %arg1: i32) -> (i32, i32, i32, i32) {
    %c0_i32 = arith.constant 0 : i32
    %c0_i32_0 = arith.constant 0 : i32
    %c0_i32_1 = arith.constant 0 : i32
    return %arg0, %arg1, %c0_i32, %c0_i32_0 : i32, i32, i32, i32
  }
  func.func @transform_3(%arg0: i32, %arg1: i32) -> (i32, i32, i32) {
    %c0_i32 = arith.constant 0 : i32
    %c0_i32_0 = arith.constant 0 : i32
    %c0_i32_1 = arith.constant 0 : i32
    %c0_i32_2 = arith.constant 0 : i32
    return %c0_i32, %c0_i32_0, %c0_i32_1 : i32, i32, i32
  }
  func.func @transform_4(%arg0: i32, %arg1: i32) -> (i32, i32) {
    %c0_i32 = arith.constant 0 : i32
    %c0_i32_0 = arith.constant 0 : i32
    %c0_i32_1 = arith.constant 0 : i32
    return %c0_i32, %c0_i32_0 : i32, i32
  }
  func.func @transform_5(%arg0: i32, %arg1: i32) -> (i32, i32) {
    %c0_i32 = arith.constant 0 : i32
    %c0_i32_0 = arith.constant 0 : i32
    %c0_i32_1 = arith.constant 0 : i32
    return %c0_i32, %c0_i32_0 : i32, i32
  }
  func.func @transform_6(%arg0: i32, %arg1: i32) -> (i32, i32, i32) {
    %c0_i32 = arith.constant 0 : i32
    %c0_i32_0 = arith.constant 0 : i32
    return %arg0, %c0_i32, %arg1 : i32, i32, i32
  }
}

</mosaic_0001>

<bundles_post_ra>
// kernel: tpu_custom_call.1
= control target key start
LH: loop header
LB: loop body
LE: loop exit
PB: predicated region body
PF: predicated region fallthrough
CT: control target
= control target key end

     0   :  { %s1855_s0 = inlined_call_operand.hbm [shape: f32[2,4,256], index: 0, kind: input, shape index: {}]   ;;  %s1856_s1 = inlined_call_operand.hbm [shape: f32[2,2,4,128], index: 1, kind: input, shape index: {}]   ;;  %s1857_s2 = inlined_call_operand.hbm [shape: f32[2,2,4,128], index: 2, kind: input, shape index: {}]   ;;  %s1858_s3 = inlined_call_operand.hbm [shape: bf16[3,4,12], index: 3, kind: input, shape index: {}]   ;;  %s1859_s4 = inlined_call_operand.hbm [shape: f32[4,1], index: 4, kind: input, shape index: {}]   ;;  %s1860_s5 = inlined_call_operand.hbm [shape: f32[4,1], index: 5, kind: input, shape index: {}]   ;;  %s1861_s6 = inlined_call_operand.hbm [shape: f32[2,4,256], index: 6, kind: output, shape index: {}]  }
   0x1   :  { %1884 = sst [smem:[#allocation27_spill]] %s1856_s1 }
   0x2   :  { %1885 = sst [smem:[#allocation28_spill]] %s1858_s3 }
   0x3   :  { %1886 = sst [smem:[#allocation29_spill]] %s1861_s6 }
   0x4   :  { %11 = vsyncpa [#allocation3], 0 }
   0x5   :  { %13 = vsyncpa [#allocation3 + $0x1], 0 }
   0x6   :  { %14 = vsyncpa [#allocation6], 0 }
   0x7   :  { %16 = vsyncpa [#allocation6 + $0x1], 0 }
   0x8   :  { %17 = vsyncpa [#allocation9], 0 }
   0x9   :  { %18 = vsyncpa [#allocation12], 0 }
   0xa   :  { %19 = vsyncpa [#allocation4], 0 }
   0xb   :  { %21 = vsyncpa [#allocation4 + $0x1], 0  ;;  %s1445_s21 = smov 0   ;;  %s1447_s22 = smov 0  }
   0xc   :  { %s1449_s23 = smov 0   ;;  %s1451_s24 = smov 0  }
   0xd   :  { %s1453_s25 = smov 0   ;;  %s1455_s26 = smov 0  }
   0xe   :  { %s1457_s27 = smov 0   ;;  %s1459_s28 = smov 0  }
   0xf LB: > { %1887 = sst [smem:[#allocation19_spill]] %s1360_s21  ;;  %s1486_s29 = sadd.s32 4294967295, %s1388_s28   ;;  %s1388_s28 = sphi %s1459_s28, %s27_s28   ;;  %s1384_s27 = sphi %s1457_s27, %s1932_s27   ;;  %s1380_s26 = sphi %s1455_s26, %s1931_s26   ;;  %s1376_s25 = sphi %s1453_s25, %s1930_s25   ;;  %s1372_s24 = sphi %s1451_s24, %s1929_s24   ;;  %s1368_s23 = sphi %s1449_s23, %s1935_s23   ;;  %s1364_s22 = sphi %s1447_s22, %s1934_s22   ;;  %s1360_s21 = sphi %s1445_s21, %s1933_s21  }
  0x10   : > { %1888 = sst [smem:[#allocation20_spill]] %s1380_s26  ;;  %s880_s30 = sadd.s32 4294967294, %s1388_s28  }
  0x11   : > { %1889 = sst [smem:[#allocation21_spill]] %s1384_s27  ;;  %p61_p0 = scmp.ne.s32.totalorder %s1364_s22, %s1360_s21 }
  0x12   : > { %p1862_p1 = scmp.eq.s32.totalorder %s1486_s29, 0  ;;  %p212_p3 = scmp.eq.s32.totalorder %s880_s30, 3 }
  0x13   : > { %p881_p5 = scmp.ge.s32.totalorder %s1388_s28, 1  ;;  %p219_p7 = scmp.lt.s32.totalorder %s1388_s28, 5 }
  0x14   : > { %p1495_p4 = por %p1862_p1, %p61_p0  ;;  %p1500_p6 = por %p212_p3, %p61_p0 }
  0x15   : > { %p1505_p8 = pnand %p881_p5, %p219_p7  ;;  %s1390_s10 = smov [#allocation8]  }
  0x16   : > { %s1890_s7 = scalar_select %p1495_p4, 1, 0 }
  0x17   : > { %s1891_s8 = scalar_select %p1500_p6, 1, 0 }
  0x18   : > { %s1893_s9 = scalar_select %p1505_p8, 1, 0 }
  0x19   : > { %1892 = sst [smem:[#allocation22_spill]] %s1891_s8  ;;  %s231_s11 = sshll.u32 %s1390_s10, 4  ;;  %s232_s11 = int_to_ptr.vmem [resolvable:$true] %s231_s11 }
  0x1a   : > { %p956_p9 = pneg %p1505_p8  ;;  %s1895_s3 = sld [smem:[#allocation28_spill]] }
  0x1c   : > { %p1513_p10 = pnand %p956_p9, %p1862_p1 }
  0x1e   : > { %s1894_s12 = scalar_select %p1513_p10, 1, 0 }
  0x1f   : > { %p1525_p12 = pneg %p1513_p10 }
  0x20   : > { %s1104_s15 = scalar_lea.hbm %s1895_s3, 96 }
  0x21   : > { %p1105_p11 = scmp.ne.s32.totalorder %s1895_s3, %s1104_s15  ;;  %p1111_p3 = scmp.lt.u32.totalorder %s1104_s15, %s1895_s3 }
  0x22   : > { %s1896_s18 = scalar_select %p1525_p12, 1, 0 }
  0x23   : > { %p1107_p13 = pnand %p1525_p12, %p1105_p11 }
  0x25   : > { %p1108_p0 = pneg %p1107_p13 }
  0x27   : > { %p1113_p5 = pnand %p1111_p3, %p1108_p0 }
  0x29   : > { %1116 = shalt.err (!%p1113_p5)
}
  0x2a   : > { %s1117_s30 = scalar_lea.vmem %s232_s11, 96  ;;  %p1125_p2 = scmp.lt.s32.totalorder %s232_s11, %s232_s11 }
  0x2b   : > { %p1118_p7 = scmp.ne.s32.totalorder %s232_s11, %s1117_s30  ;;  %p1126_p6 = scmp.lt.s32.totalorder %s1117_s30, %s1117_s30 }
  0x2d   : > { %p1120_p9 = pnand %p1118_p7, %p1525_p12  ;;  %p1127_p4 = por %p1126_p6, %p1125_p2 }
  0x2f   : > { %p1121_p1 = pneg %p1120_p9 }
  0x31   : > { %p1128_p8 = pnand %p1127_p4, %p1121_p1 }
  0x33   : > { %1131 = shalt.err (!%p1128_p8)
}
  0x34   : > { %s1391_s10 = smov 32   ;;  %s1392_s13 = smov 2  }
  0x35   : > { %959 = dma.hbm_to_vmem [thread:$0]  (!%p1513_p10), %s1895_s3, 96, %s232_s11, [#allocation9], %s1391_s10, %s1391_s10, %s1392_s13  }
  0x36   : > { %s36_s16 = sadd.s32 1, %s1380_s26  ;;  %s39_s17 = sadd.s32 1, %s1384_s27 }
  0x37   : > { %p37_p1 = scmp.ge.s32.totalorder %s36_s16, 2  ;;  %s48_s19 = sadd.s32 1, %s1368_s23 }
  0x38   : > { %p55_p2 = scmp.ne.s32.totalorder %s1368_s23, %s1364_s22  ;;  %p56_p4 = scmp.eq.s32.totalorder %s1388_s28, 0 }
  0x39   : > { %s1937_s16 = smov (%p37_p1, %s36_s16), 0  ;;  %s1939_s17 = smov (!%p37_p1, %s39_s17), %s1384_s27 }
  0x3a   : > { %1897 = sst [smem:[#allocation23_spill]] %s1937_s16  ;;  %s44_s20 = ssub.s32 %s1380_s26, %s1937_s16 }
  0x3b   : > { %p41_p6 = scmp.ge.s32.totalorder %s1939_s17, 2  ;;  %p1898_p8 = scmp.eq.s32.totalorder %s1486_s29, 3 }
  0x3c   : > { %p57_p13 = por %p56_p4, %p55_p2  ;;  %p983_p0 = scmp.lt.s32.totalorder %s1388_s28, 4 }
  0x3d   : > { %p1554_p11 = por %p1898_p8, %p55_p2  ;;  %s1941_s17 = smov (%p41_p6, %s1939_s17), 0 }
  0x3e   : > { %1901 = sst [smem:[#allocation25_spill]] %s1941_s17  ;;  %s1872_s30 = sand.u32 1, %s1368_s23  }
  0x3f   : > { %s1899_s11 = scalar_select %p1554_p11, 1, 0 }
  0x40   : > { %s887_s10 = sshll.u32 %s1384_s27, 1  ;;  %s43_s13 = ssub.s32 %s1384_s27, %s1941_s17 }
  0x41   : > { %1900 = sst [smem:[#allocation24_spill]] %s1899_s11  ;;  %s1567_s14 = sshll.u32 %s1872_s30, 2 }
  0x42   : > { %s45_s15 = sor.u32 %s44_s20, %s43_s13  ;;  %s276_s3 = sadd.s32 %s1380_s26, %s887_s10 }
  0x43   : > { %p46_p3 = scmp.eq.s32.totalorder %s45_s15, 0  ;;  %s1570_s16 = sshll.u32 %s276_s3, 6 }
  0x44   : > { %p1572_p5 = pnand %p983_p0, %p57_p13  ;;  %s287_s21 = sand.u32 1, %s1388_s28  }
  0x45   : > { %s1578_s6 = scalar_select %p46_p3, %s1368_s23, %s48_s19  }
  0x46   : > { %s1902_s8 = scalar_select %p1572_p5, 1, 0 }
  0x47   : > { %1903 = sst [smem:[#allocation26_spill]] %s1578_s6  ;;  %s1904_s1 = sld [smem:[#allocation27_spill]] }
  0x48   : > { %s291_s3 = scalar_lea.vmem [#allocation5], %s1567_s14  ;;  %s1393_s10 = smov [#allocation10]  }
  0x49   : > { %s300_s20 = sshll.u32 %s291_s3, 4  ;;  %s1589_s13 = sshll.u32 %s1393_s10, 4  ;;  %s1587_s20 = int_to_ptr.vmem [resolvable:$true] %s300_s20  ;;  %s246_s13 = int_to_ptr.vmem [resolvable:$true] %s1589_s13 }
  0x4a   : > { %s1591_s15 = scalar_lea.sflag [#allocation6], %s287_s21  ;;  %p1597_p9 = pneg %p1572_p5 }
  0x4c   : > { %s1905_s17 = scalar_select %p1597_p9, 1, 0 }
  0x4d   : > { %s1584_s30 = scalar_lea.hbm %s1904_s1, %s1570_s16  ;;  %s1137_s27 = scalar_lea.hbm %s1904_s1, 256 }
  0x4e   : > { %s1132_s19 = scalar_lea.hbm %s1584_s30, 64  ;;  %p1138_p4 = scmp.lt.u32.totalorder %s1584_s30, %s1904_s1 }
  0x4f   : > { %p1133_p7 = scmp.ne.s32.totalorder %s1584_s30, %s1132_s19  ;;  %p1139_p6 = scmp.lt.u32.totalorder %s1137_s27, %s1132_s19 }
  0x50   : > { %p1141_p13 = scmp.lt.u32.totalorder %s1132_s19, %s1584_s30 }
  0x51   : > { %p1135_p1 = pnand %p1597_p9, %p1133_p7  ;;  %p1140_p8 = por %p1139_p6, %p1138_p4 }
  0x53   : > { %p1136_p2 = pneg %p1135_p1  ;;  %p1142_p0 = por %p1141_p13, %p1140_p8 }
  0x55   : > { %p1143_p3 = pnand %p1142_p0, %p1136_p2 }
  0x57   : > { %1146 = shalt.err (!%p1143_p3)
}
  0x58   : > { %s1147_s21 = scalar_lea.vmem %s1587_s20, 64  ;;  %s1394_s11 = smov [#allocation5]  }
  0x59   : > { %p1148_p7 = scmp.ne.s32.totalorder %s1587_s20, %s1147_s21  ;;  %s1152_s3 = sshll.u32 %s1394_s11, 4  ;;  %s1153_s3 = int_to_ptr.vmem [resolvable:$false] %s1152_s3 }
  0x5a   : > { %s1154_s26 = scalar_lea.vmem %s1153_s3, 128  ;;  %p1155_p10 = scmp.lt.s32.totalorder %s1587_s20, %s1153_s3 }
  0x5b   : > { %p1150_p1 = pnand %p1148_p7, %p1597_p9  ;;  %p1156_p12 = scmp.lt.s32.totalorder %s1154_s26, %s1147_s21 }
  0x5d   : > { %p1151_p11 = pneg %p1150_p1  ;;  %p1157_p4 = por %p1156_p12, %p1155_p10 }
  0x5f   : > { %p1158_p6 = pnand %p1157_p4, %p1151_p11 }
  0x61   : > { %1161 = shalt.err (!%p1158_p6)
}
  0x62   : > { %972 = dma.hbm_to_vmem [thread:$0]  (!%p1572_p5), %s1584_s30, 64, %s1587_s20, %s1591_s15  }
  0x63   : > { %s1162_s10 = scalar_lea.hbm %s1859_s4, 64  ;;  %p1906_p10 = scmp.ne.s32.totalorder %s1896_s18, 0 }
  0x64   : > { %p1163_p2 = scmp.ne.s32.totalorder %s1859_s4, %s1162_s10  ;;  %p1169_p8 = scmp.lt.u32.totalorder %s1162_s10, %s1859_s4 }
  0x66   : > { %p1165_p12 = pnand %p1163_p2, %p1906_p10 }
  0x68   : > { %p1166_p11 = pneg %p1165_p12 }
  0x6a   : > { %p1171_p13 = pnand %p1169_p8, %p1166_p11 }
  0x6c   : > { %1174 = shalt.err (!%p1171_p13)
}
  0x6d   : > { %s1175_s26 = scalar_lea.vmem %s246_s13, 64  ;;  %p1183_p1 = scmp.lt.s32.totalorder %s246_s13, %s246_s13 }
  0x6e   : > { %p1176_p0 = scmp.ne.s32.totalorder %s246_s13, %s1175_s26  ;;  %p1184_p4 = scmp.lt.s32.totalorder %s1175_s26, %s1175_s26 }
  0x70   : > { %p1178_p3 = pnand %p1176_p0, %p1906_p10  ;;  %p1185_p6 = por %p1184_p4, %p1183_p1 }
  0x72   : > { %p1179_p7 = pneg %p1178_p3 }
  0x74   : > { %p1186_p5 = pnand %p1185_p6, %p1179_p7 }
  0x76   : > { %1189 = shalt.err (!%p1186_p5)
}
  0x77   : > { %p1907_p2 = scmp.ne.s32.totalorder %s1894_s12, 0  ;;  %s1395_s20 = smov [#allocation11]  }
  0x78   : > { %s256_s27 = sshll.u32 %s1395_s20, 4  ;;  %s1190_s11 = scalar_lea.hbm %s1860_s5, 64  ;;  %s257_s27 = int_to_ptr.vmem [resolvable:$true] %s256_s27 }
  0x79   : > { %962 = dma.hbm_to_vmem [thread:$0]  (!%p1907_p2), %s1859_s4, 64, %s246_s13, [#allocation9]  }
  0x7a   : > { %p1191_p12 = scmp.ne.s32.totalorder %s1860_s5, %s1190_s11  ;;  %p1197_p8 = scmp.lt.u32.totalorder %s1190_s11, %s1860_s5 }
  0x7c   : > { %p1193_p5 = pnand %p1191_p12, %p1906_p10 }
  0x7e   : > { %p1194_p11 = pneg %p1193_p5 }
  0x80   : > { %p1199_p13 = pnand %p1197_p8, %p1194_p11 }
  0x82   : > { %1202 = shalt.err (!%p1199_p13)
}
  0x83   : > { %s1203_s13 = scalar_lea.vmem %s257_s27, 64  ;;  %p1211_p1 = scmp.lt.s32.totalorder %s257_s27, %s257_s27 }
  0x84   : > { %p1204_p0 = scmp.ne.s32.totalorder %s257_s27, %s1203_s13  ;;  %p1212_p4 = scmp.lt.s32.totalorder %s1203_s13, %s1203_s13 }
  0x86   : > { %p1206_p3 = pnand %p1204_p0, %p1906_p10  ;;  %p1213_p6 = por %p1212_p4, %p1211_p1 }
  0x88   : > { %p1207_p7 = pneg %p1206_p3 }
  0x8a   : > { %p1214_p9 = pnand %p1213_p6, %p1207_p7 }
  0x8c   : > { %1217 = shalt.err (!%p1214_p9)
}
  0x8d   : > { %965 = dma.hbm_to_vmem [thread:$0]  (!%p1907_p2), %s1860_s5, 64, %s257_s27, [#allocation12]  }
  0x8e   : > { %s1662_s18 = scalar_lea.hbm %s1855_s0, %s1570_s16  ;;  %s271_s19 = scalar_lea.vmem [#allocation2], %s1567_s14 }
  0x8f   : > { %s280_s10 = sshll.u32 %s271_s19, 4  ;;  %s1908_s12 = sand.u32 1, %s1368_s23   ;;  %s281_s10 = int_to_ptr.vmem [resolvable:$true] %s280_s10 }
  0x90   : > { %s268_s11 = scalar_lea.sflag [#allocation3], %s1908_s12  ;;  %s1218_s21 = scalar_lea.hbm %s1662_s18, 64 }
  0x91   : > { %p1219_p9 = scmp.ne.s32.totalorder %s1662_s18, %s1218_s21  ;;  %p1909_p10 = scmp.ne.s32.totalorder %s1905_s17, 0 }
  0x92   : > { %s1223_s26 = scalar_lea.hbm %s1855_s0, 256  ;;  %p1224_p2 = scmp.lt.u32.totalorder %s1662_s18, %s1855_s0 }
  0x93   : > { %p1221_p12 = pnand %p1219_p9, %p1909_p10  ;;  %p1225_p11 = scmp.lt.u32.totalorder %s1223_s26, %s1218_s21 }
  0x94   : > { %p1227_p13 = scmp.lt.u32.totalorder %s1218_s21, %s1662_s18 }
  0x95   : > { %p1222_p5 = pneg %p1221_p12  ;;  %p1226_p8 = por %p1225_p11, %p1224_p2 }
  0x97   : > { %p1228_p0 = por %p1227_p13, %p1226_p8 }
  0x99   : > { %p1229_p3 = pnand %p1228_p0, %p1222_p5 }
  0x9b   : > { %1232 = shalt.err (!%p1229_p3)
}
  0x9c   : > { %s1233_s30 = scalar_lea.vmem %s281_s10, 64  ;;  %s1396_s6 = smov [#allocation2]  }
  0x9d   : > { %p1234_p7 = scmp.ne.s32.totalorder %s281_s10, %s1233_s30  ;;  %s1238_s20 = sshll.u32 %s1396_s6, 4  ;;  %s1239_s20 = int_to_ptr.vmem [resolvable:$false] %s1238_s20 }
  0x9e   : > { %s1240_s19 = scalar_lea.vmem %s1239_s20, 128  ;;  %p1241_p6 = scmp.lt.s32.totalorder %s281_s10, %s1239_s20 }
  0x9f   : > { %p1236_p1 = pnand %p1234_p7, %p1909_p10  ;;  %p1242_p9 = scmp.lt.s32.totalorder %s1240_s19, %s1233_s30 }
  0xa1   : > { %p1237_p4 = pneg %p1236_p1  ;;  %p1243_p12 = por %p1242_p9, %p1241_p6 }
  0xa3   : > { %p1244_p2 = pnand %p1243_p12, %p1237_p4 }
  0xa5   : > { %1247 = shalt.err (!%p1244_p2)
}
  0xa6   : > { %p1910_p11 = scmp.ne.s32.totalorder %s1902_s8, 0  ;;  %s1688_s27 = scalar_lea.hbm %s1857_s2, %s1570_s16 }
  0xa7   : > { %s311_s3 = scalar_lea.vmem [#allocation7], %s1567_s14  ;;  %s1248_s13 = scalar_lea.hbm %s1688_s27, 64 }
  0xa8   : > { %969 = dma.hbm_to_vmem [thread:$0]  (!%p1910_p11), %s1662_s18, 64, %s281_s10, %s268_s11  }
  0xa9   : > { %s320_s26 = sshll.u32 %s311_s3, 4  ;;  %p1249_p5 = scmp.ne.s32.totalorder %s1688_s27, %s1248_s13  ;;  %s321_s26 = int_to_ptr.vmem [resolvable:$true] %s320_s26 }
  0xaa   : > { %s1253_s18 = scalar_lea.hbm %s1857_s2, 256  ;;  %p1254_p0 = scmp.lt.u32.totalorder %s1688_s27, %s1857_s2 }
  0xab   : > { %p1251_p8 = pnand %p1249_p5, %p1909_p10  ;;  %p1255_p3 = scmp.lt.u32.totalorder %s1253_s18, %s1248_s13 }
  0xac   : > { %p1257_p1 = scmp.lt.u32.totalorder %s1248_s13, %s1688_s27 }
  0xad   : > { %p1252_p13 = pneg %p1251_p8  ;;  %p1256_p7 = por %p1255_p3, %p1254_p0 }
  0xaf   : > { %p1258_p4 = por %p1257_p1, %p1256_p7 }
  0xb1   : > { %p1259_p6 = pnand %p1258_p4, %p1252_p13 }
  0xb3   : > { %1262 = shalt.err (!%p1259_p6)
}
  0xb4   : > { %s1263_s16 = scalar_lea.vmem %s321_s26, 64  ;;  %s1397_s14 = smov [#allocation7]  }
  0xb5   : > { %p1264_p9 = scmp.ne.s32.totalorder %s321_s26, %s1263_s16  ;;  %s1268_s6 = sshll.u32 %s1397_s14, 4  ;;  %s1269_s6 = int_to_ptr.vmem [resolvable:$false] %s1268_s6 }
  0xb6   : > { %s1270_s20 = scalar_lea.vmem %s1269_s6, 128  ;;  %p1271_p5 = scmp.lt.s32.totalorder %s321_s26, %s1269_s6 }
  0xb7   : > { %p1266_p12 = pnand %p1264_p9, %p1909_p10  ;;  %p1272_p8 = scmp.lt.s32.totalorder %s1270_s20, %s1263_s16 }
  0xb9   : > { %p1267_p2 = pneg %p1266_p12  ;;  %p1273_p11 = por %p1272_p8, %p1271_p5 }
  0xbb   : > { %p1274_p0 = pnand %p1273_p11, %p1267_p2 }
  0xbd   : > { %1277 = shalt.err (!%p1274_p0)
}
  0xbe   : > { %p1911_p3 = scmp.ne.s32.totalorder %s1902_s8, 0  ;;  %p1912_p13 = scmp.ne.s32.totalorder %s1893_s9, 0 }
  0xbf   : > { %s1712_s17 = sand.u32 (!%p1912_p13), 1, %s1364_s22   ;;  %p1913_p10 = scmp.ne.s32.totalorder (!%p1912_p13), %s1890_s7, 0 }
  0xc0   : > { %975 = dma.hbm_to_vmem [thread:$0]  (!%p1911_p3), %s1688_s27, 64, %s321_s26, %s1591_s15  }
  0xc1   : > { %329 = sbr.rel (%p1912_p13) target bundleno = 628 (0x274), region = 44  ;;  %s1715_s19 = sshll.u32 (!%p1912_p13), %s1712_s17, 2 }
  0xc2   : > { %s332_s12 = scalar_lea.sflag (!%p1912_p13), [#allocation3], %s1712_s17  ;;  %s335_s21 = scalar_lea.vmem (!%p1912_p13), [#allocation2], %s1715_s19 }
  0xc8   : > { %1339 = dma.done.wait (%p1913_p10), %s332_s12, 64  }
  0xc9   : > { %1341 = vsyncadd (%p1913_p10), %s332_s12, 4294967232  ;;  %s340_s8 = sand.u32 1, %s1486_s29   ;;  %s344_s15 = scalar_lea.vmem [#allocation5], %s1715_s19 }
  0xca   : > { %s341_s9 = scalar_lea.sflag [#allocation6], %s340_s8 }
  0xcb   : > { %1343 = dma.done.wait (%p1913_p10), %s341_s9, 128  }
  0xcc   : > { %1345 = vsyncadd (%p1913_p10), %s341_s9, 4294967168  ;;  %s353_s27 = scalar_lea.vmem [#allocation7], %s1715_s19  ;;  %p1914_p11 = scmp.eq.s32.totalorder %s1486_s29, 0 }
  0xce   : > { %1347 = dma.done.wait (%p1914_p11), [#allocation9], 160   ;;  %p1915_p7 = pmov %p1914_p11 }
  0xd0   : > { %1349 = vsyncadd (%p1915_p7), [#allocation9], 4294967136  ;;  %p1916_p1 = pmov %p1915_p7 }
  0xd2   : > { %1351 = dma.done.wait (%p1916_p1), [#allocation12], 64   ;;  %p1917_p4 = pmov %p1916_p1 }
  0xd3   : > { %v1738_v0 = vld [vmem:[%s335_s21] sm:$0xf]  ;;  %v406_v1 = vld [vmem:[%s344_s15] sm:$0xf]  ;;  %v407_v2 = vld [vmem:[%s353_s27] sm:$0xf]  ;;  %v408_v15 = vlaneseq }
  0xd4   : > { %1353 = vsyncadd (%p1917_p4), [#allocation12], 4294967232  ;;  %v1078_v3 = vpack.i.bf16 %v1738_v0, %v406_v1  ;;  %v1068_v4 = vpack.i.bf16 %v407_v2, %v1738_v0  ;;  %s1398_s7 = smov 15   ;;  %s1399_s3 = smov 127   ;;  %v1400_v5 = vmov 0.0   ;;  %vm1401_vm0 = vmmov 0  }
  0xd5   : > { %918 = vmatprep.subr.bf16.mxu0 %v1400_v5  ;;  %924 = vmatprep.subr.bf16.mxu1 %v1400_v5  ;;  %s1402_s29 = smov 17   ;;  %s1403_s26 = smov 1   ;;  %v437_v6 = vpack.c.bf16 %v406_v1, %v406_v1  ;;  %v438_v7 = vpack.c.bf16 %v1738_v0, %v1738_v0  ;;  %v599_v10 = vpack.c.bf16 %v407_v2, %v407_v2  ;;  %v1407_v12 = vmov 0   ;;  %v672_v13 = vld [vmem:[#allocation10] sm:$0xf] }
  0xd6   : > { %1079 = vrot.lane.b32.xlu1 %v1078_v3, %s1398_s7  ;;  %1069 = vrot.lane.b32.xlu0 %v1068_v4, %s1399_s3  ;;  %s1404_s13 = smov 113   ;;  %s1405_s1 = smov 111   ;;  %v680_v14 = vld [vmem:[#allocation11] sm:$0xf]  ;;  %v409_v16 = vand.u32 127, %v408_v15  ;;  %vm445_vm1 = vcmask 121856  }
  0xd7   : > { %920 = vmatprep.mubr.msk.bf16.mxu0 %vm1401_vm0, %v1400_v5  ;;  %926 = vmatprep.mubr.msk.bf16.mxu1 %vm1401_vm0, %v1400_v5  ;;  %v452_v8 = vrot.slane %v437_v6, 6  ;;  %v1750_v9 = vrot.slane %v438_v7, 6  ;;  %s1406_s30 = smov 16   ;;  %v610_v11 = vrot.slane %v599_v10, 6  ;;  %s1408_s18 = smov 112   ;;  %vm484_vm2 = vcmask 1039360  }
  0xd8   : > { %1098 = vset.pattern.permute.xlu0 %v1407_v12  ;;  %1099 = vset.pattern.permute.xlu1 %v1407_v12  ;;  %v414_v17 = vand.u32 15, %v409_v16  ;;  %vm432_vm4 = vcmask 138240   ;;  %vm474_vm6 = vcmask 7168   ;;  %vm594_vm7 = vcmask 924672   ;;  %v497_v63 = vld [vmem:[#allocation8 + $0x2] sm:$0x3] }
  0xd9   : > { %vm604_vm8 = vcmask 908288   ;;  %vm462_vm9 = vcmask 1041408   ;;  %vm458_vm10 = vcmask 130048   ;;  %vm466_vm11 = vcmask 1043456   ;;  %v469_v10 = vld [vmem:[#allocation8] sm:$0x3] }
  0xda   : > { %1084 = vrot.lane.b32.xlu1 %v1078_v3, %s1402_s29  ;;  %1074 = vrot.lane.b32.xlu0 %v1078_v3, %s1403_s26  ;;  %vm1754_vm3 = vcmp.lt.s32.totalorder %v414_v17, 15  ;;  %vm1758_vm5 = vcmp.ge.s32.totalorder %v414_v17, 1  ;;  %vm502_vm12 = vcmask 1045504   ;;  %vm615_vm13 = vcmask 916480   ;;  %s1922_s10 = sld [smem:[#allocation24_spill]]  ;;  %s908_s11 = sshll.u32 %s1376_s25, 1 }
  0xdb   : > { %vm498_vm14 = vcmask 97280   ;;  %s714_s16 = sadd.s32 %s1372_s24, %s908_s11  ;;  %s403_s6 = scalar_lea.vmem [#allocation13], %s1715_s19 }
  0xdc   : > { %s909_s14 = sshll.u32 %s714_s16, 6  ;;  %s718_s20 = sshll.u32 %s403_s6, 4  ;;  %s1803_s20 = int_to_ptr.vmem [resolvable:$true] %s718_s20 }
  0xdd   : > { %s1923_s8 = sld [smem:[#allocation29_spill]]  ;;  %s703_s15 = scalar_lea.sflag [#allocation4], %s1712_s17 }
  0xde   : > { %1094 = vrot.lane.b32.xlu1 %v1068_v4, %s1404_s13  ;;  %1089 = vrot.lane.b32.xlu0 %v1068_v4, %s1405_s1  ;;  %s1278_s25 = scalar_lea.vmem %s1803_s20, 64  ;;  %s1409_s24 = smov [#allocation13]  }
  0xdf   : > { %p1279_p6 = scmp.ne.s32.totalorder %s1803_s20, %s1278_s25  ;;  %s1282_s19 = sshll.u32 %s1409_s24, 4  ;;  %s1283_s19 = int_to_ptr.vmem [resolvable:$false] %s1282_s19 }
  0xe0   : > { %p1924_p9 = scmp.ne.s32.totalorder %s1922_s10, 0  ;;  %s1284_s27 = scalar_lea.vmem %s1283_s19, 128 }
  0xe1   : > { %p1285_p5 = scmp.lt.s32.totalorder %s1803_s20, %s1283_s19  ;;  %p1286_p8 = scmp.lt.s32.totalorder %s1284_s27, %s1278_s25 }
  0xe2   : > { %454 = vrot.lane.b32.xlu0 %v452_v8, %s1406_s30  ;;  %456 = vrot.lane.b32.xlu1 %v1750_v9, %s1406_s30  ;;  %p1280_p12 = pnand %p1279_p6, %p1924_p9 }
  0xe3   : > { %s1801_s9 = scalar_lea.hbm %s1923_s8, %s909_s14  ;;  %p1287_p0 = por %p1286_p8, %p1285_p5 }
  0xe4   : > { %p1281_p2 = pneg %p1280_p12 }
  0xe6   : > { %611 = vrot.lane.b32.xlu0 %v1750_v9, %s1408_s18  ;;  %613 = vrot.lane.b32.xlu1 %v610_v11, %s1408_s18  ;;  %p1288_p3 = pnand %p1287_p0, %p1281_p2 }
  0xea   : > { %675 = vperm.xlu0 %1098, %v672_v13   ;;  %683 = vperm.xlu1 %1099, %v680_v14   ;;  %v625_v14 = vld [vmem:[#allocation8 + $0x4] sm:$0x3] }
 0x148   : > { %v1080_v18 = vpop.permute.xlu1 %1079  ;;  %v1070_v19 = vpop.permute.xlu0 %1069 }
 0x149   : > { %v1082_v21 = vunpack.i.h.bf16 %v1080_v18  ;;  %v1081_v22 = vunpack.i.l.bf16 %v1080_v18  ;;  %v1072_v23 = vunpack.i.h.bf16 %v1070_v19  ;;  %v1071_v24 = vunpack.i.l.bf16 %v1070_v19 }
 0x14b   : > { %v446_v25 = vsel %vm445_vm1, %v1081_v22, %v1082_v21  ;;  %v485_v26 = vsel %vm484_vm2, %v1071_v24, %v1072_v23 }
 0x14c   : > { %v1085_v28 = vpop.permute.xlu1 %1084  ;;  %v1075_v29 = vpop.permute.xlu0 %1074  ;;  %v487_v30 = vsel %vm1754_vm3, %v485_v26, 0.0  ;;  %v448_v31 = vsel %vm1754_vm3, %v446_v25, 0.0 }
 0x14d   : > { %v1087_v32 = vunpack.i.h.bf16 %v1085_v28  ;;  %v1086_v33 = vunpack.i.l.bf16 %v1085_v28  ;;  %v1077_v34 = vunpack.i.h.bf16 %v1075_v29  ;;  %v1076_v35 = vunpack.i.l.bf16 %v1075_v29 }
 0x14e   : > { %v488_v36 = vpack.c.bf16 %v487_v30, %v487_v30  ;;  %v449_v42 = vpack.c.bf16 %v448_v31, %v448_v31 }
 0x14f   : > { %v433_v37 = vsel %vm432_vm4, %v1086_v33, %v1087_v32  ;;  %v475_v38 = vsel %vm474_vm6, %v1076_v35, %v1077_v34 }
 0x150   : > { %v477_v39 = vsel %vm1758_vm5, %v475_v38, 0.0  ;;  %v1095_v40 = vpop.permute.xlu1 %1094  ;;  %v1090_v41 = vpop.permute.xlu0 %1089  ;;  %v435_v43 = vsel %vm1758_vm5, %v433_v37, 0.0  ;;  %v490_v49 = vrot.slane %v488_v36, 4  ;;  %v461_v57 = vrot.slane %v449_v42, 4 }
 0x151   : > { %v478_v44 = vpack.c.bf16 %v477_v39, %v477_v39  ;;  %v1097_v45 = vunpack.i.h.bf16 %v1095_v40  ;;  %v1096_v46 = vunpack.i.l.bf16 %v1095_v40  ;;  %v1092_v47 = vunpack.i.h.bf16 %v1090_v41 }
 0x152   : > { %v1091_v48 = vunpack.i.l.bf16 %v1090_v41  ;;  %v436_v52 = vpack.c.bf16 %v435_v43, %v435_v43 }
 0x153   : > { %v595_v50 = vsel %vm594_vm7, %v1096_v46, %v1097_v45  ;;  %v493_v51 = vsel %vm462_vm9, %v478_v44, %v1750_v9 }
 0x154   : > { %v605_v53 = vsel %vm604_vm8, %v1091_v48, %v1092_v47  ;;  %v455_v54 = vpop.permute.xlu0 %454  ;;  %v457_v55 = vpop.permute.xlu1 %456  ;;  %v495_v56 = vsel %vm466_vm11, %v493_v51, %v490_v49  ;;  %v597_v58 = vsel %vm1758_vm5, %v595_v50, 0.0 }
 0x155   : > { %v607_v59 = vsel %vm1754_vm3, %v605_v53, 0.0  ;;  %v459_v60 = vsel %vm458_vm10, %v455_v54, %v457_v55  ;;  %v503_v61 = vsel %vm502_vm12, %v495_v56, 0  ;;  %v598_v3 = vpack.c.bf16 %v597_v58, %v597_v58 }
 0x156   : > { %v608_v62 = vpack.c.bf16 %v607_v59, %v607_v59  ;;  %919 = vmatpush3.bf16.msra.mxu0 %v503_v61  ;;  %v465_v1 = vsel %vm462_vm9, %v436_v52, %v459_v60 }
 0x157   : > { %v468_v2 = vsel %vm466_vm11, %v465_v1, %v461_v57  ;;  %930 = vmatprep.subr.bf16.mxu0 %v1400_v5 }
 0x158   : > { %v618_v4 = vrot.slane %v608_v62, 4  ;;  %v612_v6 = vpop.permute.xlu0 %611  ;;  %v614_v7 = vpop.permute.xlu1 %613  ;;  %v548_v8 = vsel %vm502_vm12, %v468_v2, 0 }
 0x159   : > { %v616_v9 = vsel %vm615_vm13, %v612_v6, %v614_v7  ;;  %921 = vmatmul.mubr.msk.bf16.vlgmr.msra.gmra.mrb[0].mxu0 %vm498_vm14, %v497_v63  ;;  %925 = vmatpush3.bf16.msra.mxu1 %v548_v8 }
 0x15a   : > { %v621_v11 = vsel %vm462_vm9, %v598_v3, %v616_v9  ;;  %932 = vmatprep.mubr.msk.bf16.mxu0 %vm1401_vm0, %v1400_v5 }
 0x15b   : > { %v623_v12 = vsel %vm466_vm11, %v621_v11, %v618_v4 }
 0x15c   : > { %927 = vmatmul.mubr.msk.bf16.vlgmr.msra.gmra.mrb[0].mxu1 %vm498_vm14, %v469_v10  ;;  %v629_v13 = vsel %vm502_vm12, %v623_v12, 0 }
 0x15d   : > { %931 = vmatpush3.bf16.msra.mxu0 %v629_v13 }
 0x161   : > { %933 = vmatmul.mubr.msk.bf16.vlgmr.msra.gmra.mrb[4].mxu0 %vm498_vm14, %v625_v14 }
 0x169   : > { %v676_v24 = vpop.permute.xlu0 %675  ;;  %v684_v30 = vpop.permute.xlu1 %683 }
 0x22c   : > { %v539_v15 = vpop.f32.mrb[0].mxu0 }
 0x22d   : > { %v922_v16 = vpop.f32.mrb[1].mxu0 }
 0x22e   : > { %v542_v17 = vpop.f32.mrb[2].mxu0 }
 0x22f   : > { %v923_v18 = vpop.f32.mrb[3].mxu0  ;;  %v584_v19 = vpop.f32.mrb[0].mxu1 }
 0x230   : > { %v585_v20 = vadd.f32 %v584_v19, %v539_v15  ;;  %v928_v21 = vpop.f32.mrb[1].mxu1 }
 0x231   : > { %v587_v22 = vpop.f32.mrb[2].mxu1 }
 0x232   : > { %v929_v23 = vpop.f32.mrb[3].mxu1 }
 0x234   : > { %v665_v5 = vpop.f32.mrb[4].mxu0 }
 0x235   : > { %v671_v25 = vadd.f32 %v665_v5, %v585_v20  ;;  %v934_v26 = vpop.f32.mrb[5].mxu0 }
 0x236   : > { %v668_v27 = vpop.f32.mrb[6].mxu0 }
 0x237   : > { %v678_v28 = vadd.f32 %v676_v24, %v671_v25  ;;  %v935_v29 = vpop.f32.mrb[7].mxu0 }
 0x239   : > { %v679_v31 = vmax.f32 %v678_v28, 0.0 }
 0x23b   : > { %v686_v32 = vmul.f32 %v684_v30, %v679_v31 }
 0x23d   : > { %v687_v33 = vsel %vm466_vm11, %v686_v32, 0.0 }
 0x23e   : > { %v688_v34 = vrot.slane %v687_v33, 4 }
 0x240   : > { %v689_v35 = vadd.f32 %v688_v34, %v687_v33 }
 0x242   : > { %v690_v36 = vrot.slane %v689_v35, 2 }
 0x244   : > { %v691_v37 = vadd.f32 %v690_v36, %v689_v35 }
 0x246   : > { %v692_v38 = vrot.slane %v691_v37, 1 }
 0x248   : > { %v693_v39 = vadd.f32 %v692_v38, %v691_v37 }
 0x24a   : > { %v906_v40 = vmul.f32 -1.442695, %v693_v39 }
 0x24c   : > { %1100 = vpow2.f32 %v906_v40 }
 0x256   : > { %v1101_v41 = vpop.eup %1100 }
 0x257   : > { %v697_v42 = vadd.f32 1.0, %v1101_v41 }
 0x259   : > { %1102 = vrcp.f32 %v697_v42 }
 0x263   : > { %v1103_v43 = vpop.eup %1102 }
 0x264   : > { %v700_v44 = vmul.f32 %v1103_v43, %v1738_v0 }
 0x266   : > { %701 = vst [vmem:[%s403_s6] sm:$0xf] %v700_v44 }
 0x267   : > { %1291 = shalt.err (!%p1288_p3)
}
 0x268   : > { %s1292_s17 = scalar_lea.hbm %s1801_s9, 64  ;;  %s1296_s29 = scalar_lea.hbm %s1923_s8, 256 }
 0x269   : > { %p1293_p13 = scmp.ne.s32.totalorder %s1801_s9, %s1292_s17  ;;  %p1297_p7 = scmp.lt.u32.totalorder %s1801_s9, %s1923_s8 }
 0x26a   : > { %p1298_p1 = scmp.lt.u32.totalorder %s1296_s29, %s1292_s17  ;;  %p1300_p6 = scmp.lt.u32.totalorder %s1292_s17, %s1801_s9 }
 0x26b   : > { %p1294_p10 = pnand %p1293_p13, %p1924_p9 }
 0x26c   : > { %p1299_p4 = por %p1298_p1, %p1297_p7 }
 0x26d   : > { %p1295_p11 = pneg %p1294_p10 }
 0x26e   : > { %p1301_p12 = por %p1300_p6, %p1299_p4 }
 0x270   : > { %p1302_p2 = pnand %p1301_p12, %p1295_p11 }
 0x272   : > { %1305 = shalt.err (!%p1302_p2)
}
 0x273   : > { %954 = dma.vmem_to_hbm [thread:$0]  (%p1924_p9), %s1803_s20, 64, %s1801_s9, %s703_s15  }
 0x274 PF: > { %s1925_s1 = sld [smem:[#allocation19_spill]]  ;;  %s1926_s30 = sld [smem:[#allocation22_spill]] }
 0x275   : > { %p987_p5 = scmp.ge.s32.totalorder %s1388_s28, 2 }
 0x27a   : > { %s730_s18 = sand.u32 1, %s1925_s1   ;;  %p1927_p8 = scmp.ne.s32.totalorder %s1926_s30, 0 }
 0x27b   : > { %s731_s11 = scalar_lea.sflag [#allocation4], %s730_s18 }
 0x27c   : > { %p977_p0 = pnand %p987_p5, %p1927_p8 }
 0x27e   : > { %1355 = dma.done.wait (!%p977_p0), %s731_s11, 64  }
 0x27f   : > { %1357 = vsyncadd (!%p977_p0), %s731_s11, 4294967232  ;;  %s27_s28 = sadd.s32 1, %s1388_s28   ;;  %s1928_s10 = sld [smem:[#allocation26_spill]] }
 0x280   : > { %p24_p3 = scmp.ge.s32.totalorder %s27_s28, 6   ;;  %s1929_s24 = sld [smem:[#allocation20_spill]] }
 0x281   : > { %s1930_s25 = sld [smem:[#allocation21_spill]]  ;;  %s1931_s26 = sld [smem:[#allocation23_spill]] }
 0x282   : > { %s1932_s27 = sld [smem:[#allocation25_spill]]  ;;  %s1933_s21 = smov %s1364_s22 }
 0x283   : > { %s1934_s22 = smov %s1368_s23  ;;  %26 = sbr.rel (!%p24_p3) target bundleno = 15 (0xf), region = 127 }
 0x285   : > { %s1935_s23 = smov %s1928_s10 }
 0x28a   :  { %736 = vsyncpa [#allocation3], 1 }
 0x28b   :  { %738 = vsyncpa [#allocation3 + $0x1], 1 }
 0x28c   :  { %739 = vsyncpa [#allocation6], 1 }
 0x28d   :  { %741 = vsyncpa [#allocation6 + $0x1], 1 }
 0x28e   :  { %742 = vsyncpa [#allocation9], 1 }
 0x28f   :  { %743 = vsyncpa [#allocation12], 1 }
 0x290   :  { %744 = vsyncpa [#allocation4], 1 }
 0x291   :  { %746 = vsyncpa [#allocation4 + $0x1], 1 }

</bundles_post_ra>
